<compile_context>
chip_gen: v7x
topology: tpu7x:2x2x1
jax: 0.10.0
libtpu: 0.0.40
codegen_flags: <defaults>
</compile_context>

<pallas_src>
import functools
import math

import jax
import jax.numpy as jnp
from jax.experimental import pallas as pl
from jax.experimental.pallas import tpu as pltpu

EPS = 1e-5
_VMEM_LIMIT = 32 * 1024 * 1024       # scoped VMEM request (<= v7x's 64 MiB physical, raises v5e's 16 MiB default)
_MAX_BLOCK_ELEMS = 1 << 20           # <= 4 MiB f32 per x block
_MAX_TILE_D = 16384                  # only tile D beyond this (never hit for realistic embed_dim)
_FUSED_VMEM_BYTES = 12 * 1024 * 1024  # threshold for the single-kernel fast path


def _round_up(x, m):
    return ((x + m - 1) // m) * m


def _cdiv(a, b):
    return -(-a // b)


# --------------------------------------------------------------------------------------
# Kernels
# --------------------------------------------------------------------------------------
def _fused_kernel(x_ref, g_ref, b_ref, o_ref, *, n_rows, eps):
    """Whole problem resident in VMEM: stats + finalize + apply in one pass."""
    x = x_ref[...].astype(jnp.float32)                       # (N, D)
    inv_n = 1.0 / n_rows
    mean = jnp.sum(x, axis=0, keepdims=True) * inv_n
    xc = x - mean
    var = jnp.sum(xc * xc, axis=0, keepdims=True) * inv_n    # biased (training-mode) variance
    scale = g_ref[...].astype(jnp.float32) * jax.lax.rsqrt(var + eps)
    y = xc * scale + b_ref[...].astype(jnp.float32)
    o_ref[...] = y.astype(o_ref.dtype)


def _stats_kernel(x_ref, sum_ref, sq_ref, *, tile_rows, per_split, n_rows, need_mask):
    """Accumulate per-lane sum / sum-of-squares over the (innermost) N-tile grid axis."""
    n = pl.program_id(2)

    @pl.when(n == 0)
    def _():
        sum_ref[...] = jnp.zeros_like(sum_ref)
        sq_ref[...] = jnp.zeros_like(sq_ref)

    x = x_ref[...].astype(jnp.float32)
    if need_mask:
        # Global tile id (unclamped): phantom split iterations and the ragged last tile
        # contribute zero.
        tile_id = pl.program_id(0) * per_split + n
        row0 = tile_id * tile_rows
        rows = jax.lax.broadcasted_iota(jnp.int32, x.shape, 0) + row0
        x = jnp.where(rows < n_rows, x, 0.0)

    sum_ref[...] += jnp.sum(x, axis=0, keepdims=True).reshape(sum_ref.shape)
    sq_ref[...] += jnp.sum(x * x, axis=0, keepdims=True).reshape(sq_ref.shape)


def _apply_kernel(x_ref, scale_ref, shift_ref, o_ref):
    """y = x * scale + shift with precomputed (affine-fused) per-feature coefficients."""
    y = x_ref[...].astype(jnp.float32) * scale_ref[...] + shift_ref[...]
    o_ref[...] = y.astype(o_ref.dtype)


# --------------------------------------------------------------------------------------
# Wrapper
# --------------------------------------------------------------------------------------
def normalization_forward(x, gamma, beta, *, eps=EPS, tile_n=1024):
    """BatchNorm1d-style normalization of x:(B, S, D) with affine (gamma, beta):(D,)."""
    B, S, D = x.shape
    N = B * S
    x2d = x.reshape(N, D)
    itemsize = x.dtype.itemsize
    rows_align = max(8, 32 // itemsize)          # f32: 8, bf16: 16, int8/fp8: 32 (sublane packing)

    # ---------------- fast path: single fused kernel, everything resident in VMEM ---------------
    lanes = _round_up(D, 128)
    est_bytes = _round_up(N, rows_align) * lanes * (2 * itemsize + 3 * 4)
    if est_bytes <= _FUSED_VMEM_BYTES:
        out2d = pl.pallas_call(
            functools.partial(_fused_kernel, n_rows=N, eps=eps),
            out_shape=jax.ShapeDtypeStruct((N, D), x.dtype),
            compiler_params=pltpu.CompilerParams(vmem_limit_bytes=_VMEM_LIMIT),
        )(x2d, gamma.reshape(1, D), beta.reshape(1, D))
        return out2d.reshape(B, S, D)

    # ---------------- lane-dense working layout (fold rows into lanes for small D) --------------
    fold = 1
    if D < 128 and 128 % D == 0 and N % (128 // D) == 0:
        fold = 128 // D
    n_work, d_work = N // fold, D * fold
    x_work = x2d.reshape(n_work, d_work)         # metadata-only reshape

    # ---------------- tiling: full-row tiles (contiguous DMA), large N tiles ---------------------
    if d_work > _MAX_TILE_D and d_work % 128 == 0:
        tile_d = 128
        for cand in range(_MAX_TILE_D, 127, -128):
            if d_work % cand == 0:
                tile_d = cand
                break
    else:
        tile_d = d_work                           # full rows -> D grid axis has a single tile
    budget_rows = max(rows_align, (_MAX_BLOCK_ELEMS // tile_d) // rows_align * rows_align)
    tile_rows = min(tile_n, budget_rows, _round_up(n_work, rows_align))
    tile_rows = max(rows_align, tile_rows // rows_align * rows_align)

    grid_d = d_work // tile_d
    n_tiles = _cdiv(n_work, tile_rows)

    # 2-way split of the N reduction (keeps both v7x TensorCores busy); only when (nearly) free.
    n_split = 2 if (n_tiles >= 2 and (n_tiles % 2 == 0 or n_tiles >= 8)) else 1
    per_split = _cdiv(n_tiles, n_split)
    phantom = n_split * per_split > n_tiles
    need_mask = (n_work % tile_rows != 0) or phantom

    if phantom:
        def x_map1(c, d, n):
            return (jnp.minimum(c * per_split + n, n_tiles - 1), d)
    else:
        def x_map1(c, d, n):
            return (c * per_split + n, d)

    # ---------------- pass 1: per-feature sum / sum-of-squares ----------------------------------
    sums, sqs = pl.pallas_call(
        functools.partial(_stats_kernel, tile_rows=tile_rows, per_split=per_split,
                          n_rows=n_work, need_mask=need_mask),
        out_shape=(
            jax.ShapeDtypeStruct((n_split, 1, d_work), jnp.float32),
            jax.ShapeDtypeStruct((n_split, 1, d_work), jnp.float32),
        ),
        grid=(n_split, grid_d, per_split),
        in_specs=[pl.BlockSpec((tile_rows, tile_d), x_map1)],
        out_specs=(
            pl.BlockSpec((1, 1, tile_d), lambda c, d, n: (c, 0, d)),
            pl.BlockSpec((1, 1, tile_d), lambda c, d, n: (c, 0, d)),
        ),
        compiler_params=pltpu.CompilerParams(
            dimension_semantics=("parallel", "parallel", "arbitrary"),
            vmem_limit_bytes=_VMEM_LIMIT,
        ),
    )(x_work)

    # ---------------- tiny O(D) finalize: fused affine coefficients -----------------------------
    s = jnp.sum(sums, axis=(0, 1))
    ss = jnp.sum(sqs, axis=(0, 1))
    if fold > 1:                                  # combine the fold lane-group partials
        s = s.reshape(fold, D).sum(axis=0)
        ss = ss.reshape(fold, D).sum(axis=0)
    inv_n = 1.0 / N
    mean = s * inv_n
    var = jnp.maximum(ss * inv_n - mean * mean, 0.0)   # biased (training-mode) variance
    scale = gamma.astype(jnp.float32) * jax.lax.rsqrt(var + eps)
    shift = beta.astype(jnp.float32) - mean * scale
    if fold > 1:
        scale_w = jnp.tile(scale, fold).reshape(1, d_work)
        shift_w = jnp.tile(shift, fold).reshape(1, d_work)
    else:
        scale_w = scale.reshape(1, d_work)
        shift_w = shift.reshape(1, d_work)

    # ---------------- pass 2: streaming y = x * scale + shift -----------------------------------
    out_work = pl.pallas_call(
        _apply_kernel,
        out_shape=jax.ShapeDtypeStruct((n_work, d_work), x.dtype),
        grid=(grid_d, n_tiles),
        in_specs=[
            pl.BlockSpec((tile_rows, tile_d), lambda d, n: (n, d)),
            pl.BlockSpec((1, tile_d), lambda d, n: (0, d)),
            pl.BlockSpec((1, tile_d), lambda d, n: (0, d)),
        ],
        out_specs=pl.BlockSpec((tile_rows, tile_d), lambda d, n: (n, d)),
        compiler_params=pltpu.CompilerParams(
            dimension_semantics=("parallel", "parallel"),
            vmem_limit_bytes=_VMEM_LIMIT,
        ),
    )(x_work, scale_w, shift_w)

    return out_work.reshape(B, S, D)


# --------------------------------------------------------------------------------------
# Self-test
# --------------------------------------------------------------------------------------
if __name__ == "__main__":
    master_key = jax.random.PRNGKey(0)

    def run_case(B, S, D, key):
        kx, kg, kb = jax.random.split(key, 3)
        x = jax.random.normal(kx, (B, S, D), dtype=jnp.float32)
        # init_parameters(): U(-stdv, stdv), stdv = 1/sqrt(D)
        stdv = 1.0 / math.sqrt(D)
        gamma = jax.random.uniform(kg, (D,), minval=-stdv, maxval=stdv, dtype=jnp.float32)
        beta = jax.random.uniform(kb, (D,), minval=-stdv, maxval=stdv, dtype=jnp.float32)

        out = jax.block_until_ready(normalization_forward(x, gamma, beta))

        # Pure-JAX reference (training-mode BatchNorm1d semantics on the flattened rows)
        x2d = x.reshape(-1, D)
        mean = x2d.mean(axis=0, keepdims=True)
        var = ((x2d - mean) ** 2).mean(axis=0, keepdims=True)
        ref = ((x2d - mean) / jnp.sqrt(var + EPS) * gamma + beta).reshape(B, S, D)
        assert jnp.allclose(out, ref, atol=1e-4, rtol=1e-4), f"mismatch vs reference for {(B, S, D)}"

    # Primary small shape implied by the module (batch, seq, embed_dim) -> fused fast path.
    run_case(2, 8, 32, jax.random.fold_in(master_key, 0))
    # Tiled two-pass path: ragged N edge, odd tile count -> 2-way split with clamped phantom tile.
    run_case(2, 4500, 256, jax.random.fold_in(master_key, 1))
    # Tiled path with lane folding (D < 128) and an even 2-way reduction split.
    run_case(4, 2048, 64, jax.random.fold_in(master_key, 2))

    print("KERNEL_OK")
</pallas_src>

<mosaic_0001>
module attributes {stable_mosaic.version = 11 : i64} {
  func.func @_fused_kernel(%arg0: memref<16x32xf32, #tpu.memory_space<vmem>>, %arg1: memref<1x32xf32, #tpu.memory_space<vmem>>, %arg2: memref<1x32xf32, #tpu.memory_space<vmem>>, %arg3: memref<16x32xf32, #tpu.memory_space<vmem>>) attributes {dimension_semantics = [], scalar_prefetch = 0 : i64, scratch_operands = 0 : i64, tpu.core_type = #tpu.core_type<tc>} {
    %c0 = arith.constant 0 : index
    %c0_0 = arith.constant 0 : index
    %0 = vector.load %arg0[%c0, %c0_0] : memref<16x32xf32, #tpu.memory_space<vmem>>, vector<16x32xf32>
    %cst = arith.constant dense<0.000000e+00> : vector<32xf32>
    %1 = vector.multi_reduction <add>, %0, %cst [0] : vector<16x32xf32> to vector<32xf32>
    %2 = vector.shape_cast %1 : vector<32xf32> to vector<1x32xf32>
    %cst_1 = arith.constant 6.250000e-02 : f32
    %3 = vector.broadcast %cst_1 : f32 to vector<1x32xf32>
    %4 = arith.mulf %2, %3 : vector<1x32xf32>
    %5 = vector.broadcast %4 : vector<1x32xf32> to vector<16x32xf32>
    %6 = arith.subf %0, %5 : vector<16x32xf32>
    %7 = arith.mulf %6, %6 : vector<16x32xf32>
    %cst_2 = arith.constant dense<0.000000e+00> : vector<32xf32>
    %8 = vector.multi_reduction <add>, %7, %cst_2 [0] : vector<16x32xf32> to vector<32xf32>
    %9 = vector.shape_cast %8 : vector<32xf32> to vector<1x32xf32>
    %cst_3 = arith.constant 6.250000e-02 : f32
    %10 = vector.broadcast %cst_3 : f32 to vector<1x32xf32>
    %11 = arith.mulf %9, %10 : vector<1x32xf32>
    %c0_4 = arith.constant 0 : index
    %c0_5 = arith.constant 0 : index
    %12 = vector.load %arg1[%c0_4, %c0_5] : memref<1x32xf32, #tpu.memory_space<vmem>>, vector<1x32xf32>
    %cst_6 = arith.constant 9.99999974E-6 : f32
    %13 = vector.broadcast %cst_6 : f32 to vector<1x32xf32>
    %14 = arith.addf %11, %13 : vector<1x32xf32>
    %15 = math.rsqrt %14 : vector<1x32xf32>
    %16 = arith.mulf %12, %15 : vector<1x32xf32>
    %17 = vector.broadcast %16 : vector<1x32xf32> to vector<16x32xf32>
    %18 = arith.mulf %6, %17 : vector<16x32xf32>
    %c0_7 = arith.constant 0 : index
    %c0_8 = arith.constant 0 : index
    %19 = vector.load %arg2[%c0_7, %c0_8] : memref<1x32xf32, #tpu.memory_space<vmem>>, vector<1x32xf32>
    %20 = vector.broadcast %19 : vector<1x32xf32> to vector<16x32xf32>
    %21 = arith.addf %18, %20 : vector<16x32xf32>
    %c0_9 = arith.constant 0 : index
    %c0_10 = arith.constant 0 : index
    %22 = vector.load %arg3[%c0_9, %c0_10] : memref<16x32xf32, #tpu.memory_space<vmem>>, vector<16x32xf32>
    tpu.vector_store %arg3[%c0_9, %c0_10], %21 {strides = array<i32>} : memref<16x32xf32, #tpu.memory_space<vmem>>, vector<16x32xf32>,
    return
  }
}

</mosaic_0001>

<bundles_post_ra>
// kernel: tpu_custom_call.1
= control target key start
LH: loop header
LB: loop body
LE: loop exit
PB: predicated region body
PF: predicated region fallthrough
CT: control target
= control target key end

     0   :  { %8 = vsyncpa [#allocation3], 0  ;;  %s217_s0 = inlined_call_operand.hbm [shape: f32[16,32], index: 0, kind: input, shape index: {}]   ;;  %s218_s1 = inlined_call_operand.vmem [shape: f32[1,32], index: 1, kind: input, shape index: {}]   ;;  %s219_s2 = inlined_call_operand.vmem [shape: f32[1,32], index: 2, kind: input, shape index: {}]   ;;  %s220_s3 = inlined_call_operand.hbm [shape: f32[16,32], index: 3, kind: output, shape index: {}]  }
   0x1   :  { %9 = vsyncpa [#allocation4], 0  ;;  %s151_s12 = smov [#allocation2]   ;;  %s103_s16 = scalar_lea.hbm %s217_s0, 256 }
   0x2   :  { %s15_s13 = sshll.u32 %s151_s12, 4  ;;  %p104_p0 = scmp.ne.s32.totalorder %s217_s0, %s103_s16  ;;  %s16_s13 = int_to_ptr.vmem [resolvable:$true] %s15_s13 }
   0x3   :  { %p107_p1 = scmp.lt.u32.totalorder %s103_s16, %s217_s0 }
   0x5   :  { %p109_p2 = pnand %p107_p1, %p104_p0 }
   0x7   :  { %112 = shalt.err (!%p109_p2)
}
   0x8   :  { %s113_s21 = scalar_lea.vmem %s16_s13, 256  ;;  %p118_p4 = scmp.lt.s32.totalorder %s16_s13, %s16_s13 }
   0x9   :  { %p114_p3 = scmp.ne.s32.totalorder %s16_s13, %s113_s21  ;;  %p119_p5 = scmp.lt.s32.totalorder %s113_s21, %s113_s21 }
   0xb   :  { %p120_p6 = por %p119_p5, %p118_p4 }
   0xd   :  { %p121_p7 = pnand %p120_p6, %p114_p3 }
   0xf   :  { %124 = shalt.err (!%p121_p7)
}
  0x10   :  { %s152_s22 = smov 128   ;;  %s153_s23 = smov 8  }
  0x11   :  { %21 = dma.hbm_to_vmem [thread:$0]  %s217_s0, 256, %s16_s13, [#allocation3], %s152_s22, %s152_s22, %s153_s23  }
  0x12   :  { %147 = dma.done.wait [#allocation3], 256  }
  0x13   :  { %148 = vsyncadd [#allocation3], 4294967040  ;;  %vm31_vm0 = vcmask 261120   ;;  %v29_v0 = vld [vmem:[#allocation2] sm:$0xff]  ;;  %v30_v1 = vld [vmem:[#allocation2 + $0x8] sm:$0xff]  ;;  %v61_v27 = vlaneseq  ;;  %s154_s29 = smov [#allocation5]  }
  0x14   :  { %v32_v2 = vsel %vm31_vm0, %v29_v0, 0.0  ;;  %v33_v3 = vsel %vm31_vm0, %v30_v1, 0.0  ;;  %v56_v29 = vld [vmem:[%s218_s1] sm:$0x1]  ;;  %s84_s30 = sshll.u32 %s154_s29, 4  ;;  %s85_s30 = int_to_ptr.vmem [resolvable:$true] %s84_s30 }
  0x15   :  { %v34_v4 = vadd.f32 %v33_v3, %v32_v2  ;;  %v62_v28 = vshrl.u32 %v61_v27, 7  ;;  %v96_v34 = vld [vmem:[%s219_s2] ss:$0 sm:$0xff]  ;;  %s125_s1 = scalar_lea.vmem %s85_s30, 256  ;;  %p130_p9 = scmp.lt.s32.totalorder %s85_s30, %s85_s30 }
  0x16   :  { %p126_p8 = scmp.ne.s32.totalorder %s85_s30, %s125_s1  ;;  %p131_p10 = scmp.lt.s32.totalorder %s125_s1, %s125_s1 }
  0x17   :  { %v35_v5 = vrot.slane %v34_v4, 4  ;;  %v63_v30 = vsub.s32 0, %v62_v28 }
  0x18   :  { %p132_p11 = por %p131_p10, %p130_p9 }
  0x19   :  { %v36_v6 = vadd.f32 %v35_v5, %v34_v4 }
  0x1a   :  { %p133_p12 = pnand %p132_p11, %p126_p8 }
  0x1b   :  { %v37_v7 = vrot.slane %v36_v6, 2 }
  0x1d   :  { %v38_v8 = vadd.f32 %v37_v7, %v36_v6 }
  0x1f   :  { %v39_v9 = vrot.slane %v38_v8, 1 }
  0x21   :  { %v40_v10 = vadd.f32 %v39_v9, %v38_v8 }
  0x23   :  { %v41_v11 = vmul.f32 0.0625, %v40_v10 }
  0x25   :  { %v42_v12 = vsub.f32 %v29_v0, %v41_v11  ;;  %v43_v13 = vsub.f32 %v30_v1, %v41_v11 }
  0x27   :  { %v44_v14 = vmul.f32 %v42_v12, %v42_v12  ;;  %v45_v15 = vmul.f32 %v43_v13, %v43_v13 }
  0x29   :  { %v46_v16 = vsel %vm31_vm0, %v44_v14, 0.0  ;;  %v47_v17 = vsel %vm31_vm0, %v45_v15, 0.0 }
  0x2a   :  { %v48_v18 = vadd.f32 %v47_v17, %v46_v16 }
  0x2c   :  { %v49_v19 = vrot.slane %v48_v18, 4 }
  0x2e   :  { %v50_v20 = vadd.f32 %v49_v19, %v48_v18 }
  0x30   :  { %v51_v21 = vrot.slane %v50_v20, 2 }
  0x32   :  { %v52_v22 = vadd.f32 %v51_v21, %v50_v20 }
  0x34   :  { %v53_v23 = vrot.slane %v52_v22, 1 }
  0x36   :  { %v54_v24 = vadd.f32 %v53_v23, %v52_v22 }
  0x38   :  { %v55_v25 = vmul.f32 0.0625, %v54_v24 }
  0x3a   :  { %v57_v26 = vadd.f32 1e-05, %v55_v25 }
  0x3c   :  { %101 = vrsqrt.f32 %v57_v26 }
  0x46   :  { %v102_v31 = vpop.eup %101 }
  0x47   :  { %v59_v32 = vmul.f32 %v102_v31, %v56_v29 }
  0x49   :  { %v64_v33 = vrot.slane %v59_v32, %v63_v30 }
  0x4b   :  { %v66_v35 = vmul.f32 %v64_v33, %v42_v12  ;;  %v67_v36 = vmul.f32 %v64_v33, %v43_v13 }
  0x4d   :  { %v75_v37 = vadd.f32 %v96_v34, %v66_v35  ;;  %v76_v38 = vadd.f32 %v96_v34, %v67_v36 }
  0x4f   :  { %77 = vst.msk [vmem:[#allocation5] sm:$0xff] %vm31_vm0, %v75_v37  ;;  %78 = vst.msk [vmem:[#allocation5 + $0x8] sm:$0xff] %vm31_vm0, %v76_v38 }
  0x50   :  { %136 = shalt.err (!%p133_p12)
}
  0x51   :  { %s137_s5 = scalar_lea.hbm %s220_s3, 256 }
  0x52   :  { %p138_p13 = scmp.ne.s32.totalorder %s220_s3, %s137_s5  ;;  %p141_p0 = scmp.lt.u32.totalorder %s137_s5, %s220_s3 }
  0x54   :  { %p143_p1 = pnand %p141_p0, %p138_p13 }
  0x56   :  { %146 = shalt.err (!%p143_p1)
}
  0x57   :  { %90 = dma.vmem_to_hbm [thread:$0]  %s85_s30, 256, %s220_s3, [#allocation4], %s152_s22, %s152_s22, %s153_s23  }
  0x58   :  { %149 = dma.done.wait [#allocation4], 256  }
  0x59   :  { %150 = vsyncadd [#allocation4], 4294967040 }
  0x5a   :  { %94 = vsyncpa [#allocation3], 1 }
  0x5b   :  { %95 = vsyncpa [#allocation4], 1 }

</bundles_post_ra>
